<compile_context>
chip_gen: v7x
topology: tpu7x:2x2x1
jax: 0.10.0
libtpu: 0.0.40
codegen_flags: <defaults>
</compile_context>

<pallas_src>
import functools

import jax
import jax.numpy as jnp
from jax.experimental import pallas as pl
from jax.experimental.pallas import tpu as pltpu


def _identity_kernel(x_ref, o_ref):
    # Pure pass-through: copy one VMEM tile.
    o_ref[...] = x_ref[...]


_LANE_CHOICES = (2048, 1024, 512, 256, 128)   # wide, lane-dense column widths
_TARGET_BLOCK_BYTES = 2 * 1024 * 1024         # per block; x2 bufs x (in+out) ~= 8 MiB VMEM


def _sublane_multiple(dtype) -> int:
    # f32 -> 8, bf16/f16 -> 16, int8/fp8 -> 32 second-to-last-dim rows per tile.
    itemsize = jnp.dtype(dtype).itemsize
    return max(8, 8 * (4 // max(1, itemsize)))


def _pick_layout(total: int, dtype):
    """Choose a lane-dense (rows, cols) factorization and a row-tile size."""
    itemsize = jnp.dtype(dtype).itemsize
    sublanes = _sublane_multiple(dtype)

    cols = None
    for c in _LANE_CHOICES:
        if total % c == 0:
            cols = c
            break
    if cols is None:
        # Element count not a multiple of 128: single full-extent (1, total)
        # block (exempt from the (8, 128) rule).  Fine for small/odd shapes.
        return 1, total, 1

    rows = total // cols
    max_rows = max(sublanes, _TARGET_BLOCK_BYTES // (cols * itemsize))
    if rows <= max_rows:
        return rows, cols, rows            # already a small single block

    # Prefer a sublane-aligned tile that divides `rows` exactly (no ragged tail)
    r = (max_rows // sublanes) * sublanes
    while r >= sublanes:
        if rows % r == 0:
            return rows, cols, r
        r -= sublanes
    # Otherwise use a sublane-aligned tile; Pallas masks the partial last block.
    return rows, cols, (max_rows // sublanes) * sublanes


@functools.partial(jax.jit, static_argnames=("alias_input",))
def identity(x: jax.Array, *, alias_input: bool = False) -> jax.Array:
    """Identity forward pass: same shape, dtype, and values as the input.

    The true production Identity is simply `return x`; this Pallas copy exists
    to satisfy the kernel requirement with minimal HBM traffic.
    """
    total = x.size
    if total == 0:
        return x

    rows, cols, block_rows = _pick_layout(total, x.dtype)
    x2d = x.reshape(rows, cols)            # no padding, no extra HBM copies

    spec = pl.BlockSpec((block_rows, cols), lambda i: (i, 0))

    out2d = pl.pallas_call(
        _identity_kernel,
        out_shape=jax.ShapeDtypeStruct((rows, cols), x.dtype),
        grid=(pl.cdiv(rows, block_rows),),
        in_specs=[spec],
        out_specs=spec,
        compiler_params=pltpu.CompilerParams(
            # "parallel": v7x's two TensorCores split the copy; neutral on
            # single-TC v5e/v6e.
            dimension_semantics=("parallel",),
        ),
        # Legal because input/output shapes+dtypes match exactly (no padding).
        # Only a win when the caller donates x (in-place copy, one HBM buffer).
        input_output_aliases={0: 0} if alias_input else {},
    )(x2d)

    return out2d.reshape(x.shape)


if __name__ == "__main__":
    key = jax.random.PRNGKey(0)

    # Primary: small NCHW input consistent with the segmentation module.
    x = jax.random.normal(key, (2, 4, 16, 16), dtype=jnp.float32)
    y = identity(x)
    jax.block_until_ready(y)
    assert y.shape == x.shape, (y.shape, x.shape)
    assert y.dtype == x.dtype, (y.dtype, x.dtype)
    assert bool(jnp.all(y == x)), "Identity output mismatch (primary)"

    # Secondary: exercises the multi-block tiled path (grid > 1, 2 MiB blocks).
    k2, k3 = jax.random.split(key)
    x2 = jax.random.normal(k2, (2, 4, 256, 512), dtype=jnp.float32)
    y2 = identity(x2)
    jax.block_until_ready(y2)
    assert bool(jnp.all(y2 == x2)), "Identity output mismatch (tiled)"

    # Tertiary: odd element count (not a multiple of 128) -> full-extent block.
    x3 = jax.random.normal(k3, (3, 5, 7, 11), dtype=jnp.float32)
    y3 = identity(x3)
    jax.block_until_ready(y3)
    assert y3.shape == x3.shape and y3.dtype == x3.dtype
    assert bool(jnp.all(y3 == x3)), "Identity output mismatch (odd shape)"

    print("KERNEL_OK")
</pallas_src>

<mosaic_0001>
module attributes {stable_mosaic.version = 11 : i64} {
  func.func @_identity_kernel(%arg0: i32, %arg1: memref<1x2048xf32, #tpu.memory_space<vmem>>, %arg2: memref<1x2048xf32, #tpu.memory_space<vmem>>) attributes {dimension_semantics = [#tpu.dimension_semantics<parallel>], iteration_bounds = array<i64: 1>, scalar_prefetch = 0 : i64, scratch_operands = 0 : i64, tpu.core_type = #tpu.core_type<tc>, window_params = [{transform_indices = @transform_0, window_bounds = array<i64: 1, 2048>}, {transform_indices = @transform_1, window_bounds = array<i64: 1, 2048>}]} {
    %c0 = arith.constant 0 : index
    %c0_0 = arith.constant 0 : index
    %0 = vector.load %arg1[%c0, %c0_0] : memref<1x2048xf32, #tpu.memory_space<vmem>>, vector<1x2048xf32>
    %c0_1 = arith.constant 0 : index
    %c0_2 = arith.constant 0 : index
    %1 = vector.load %arg2[%c0_1, %c0_2] : memref<1x2048xf32, #tpu.memory_space<vmem>>, vector<1x2048xf32>
    tpu.vector_store %arg2[%c0_1, %c0_2], %0 {strides = array<i32>} : memref<1x2048xf32, #tpu.memory_space<vmem>>, vector<1x2048xf32>,
    return
  }
  func.func @transform_0(%arg0: i32) -> (i32, i32) {
    %c0_i32 = arith.constant 0 : i32
    %c0_i32_0 = arith.constant 0 : i32
    return %arg0, %c0_i32 : i32, i32
  }
  func.func @transform_1(%arg0: i32) -> (i32, i32) {
    %c0_i32 = arith.constant 0 : i32
    %c0_i32_0 = arith.constant 0 : i32
    return %arg0, %c0_i32 : i32, i32
  }
}

</mosaic_0001>

<bundles_post_ra>
// kernel: identity.1
= control target key start
LH: loop header
LB: loop body
LE: loop exit
PB: predicated region body
PF: predicated region fallthrough
CT: control target
= control target key end

     0   :  { %s38_s0 = inlined_call_operand.vmem [shape: f32[1,2048], index: 0, kind: input, shape index: {}]   ;;  %s39_s1 = inlined_call_operand.vmem [shape: f32[1,2048], index: 1, kind: output, shape index: {}]  }
   0x1   :  { %v8_v0 = vld [vmem:[%s38_s0] sm:$0xff]  ;;  %v9_v1 = vld [vmem:[%s38_s0 + $0x8] sm:$0xff] }
   0x2   :  { %10 = vst [vmem:[%s39_s1] sm:$0xff] %v8_v0  ;;  %11 = vst [vmem:[%s39_s1 + $0x8] sm:$0xff] %v9_v1 }

</bundles_post_ra>
